<compile_context>
chip_gen: v7x
topology: tpu7x:2x2x1
jax: 0.10.0
libtpu: 0.0.40
codegen_flags: <defaults>
</compile_context>

<pallas_src>
import functools

import jax
import jax.numpy as jnp
from jax import lax
from jax.experimental import pallas as pl
from jax.experimental.pallas import tpu as pltpu

LANES = 128
SUBLANES = 8
TILE_R = 8192          # rows per grid step: (8192,128) f32 = 4 MiB per input tile
CHUNK_R = 128          # rows folded per inner-loop iteration (register friendly)
NCORES = 2             # leading "parallel" axis -> 2 TensorCores on v7x
VMEM_LIMIT_BYTES = 32 * 1024 * 1024


def _round_up(a, b):
    return ((a + b - 1) // b) * b


def _icmse_partial_kernel(x_ref, y_ref, o_ref,
                          sx_ref, sy_ref, sxx_ref, syy_ref, sxy_ref, sd2_ref,
                          *, bpc, block_r, chunk_r, valid_rows):
    c = pl.program_id(0)           # core-split axis ("parallel")
    t = pl.program_id(1)           # reduction axis ("arbitrary")
    last_t = pl.num_programs(1) - 1
    acc_refs = (sx_ref, sy_ref, sxx_ref, syy_ref, sxy_ref, sd2_ref)

    @pl.when(t == 0)
    def _():
        for r in acc_refs:
            r[...] = jnp.zeros_like(r)

    n_chunks = block_r // chunk_r
    # Logical first row of this tile (unclamped; the index_map clamps the
    # actual DMA window, the mask below uses the logical index).
    block_start = (c * bpc + t) * block_r

    def fold(v):
        # (chunk_r,128) -> (8,128): sublane-aligned reshape, pure VPU adds.
        return jnp.sum(v.reshape(-1, SUBLANES, LANES), axis=0)

    def chunk_loop(masked):
        def body(ci, acc):
            r0 = pl.multiple_of(ci * chunk_r, chunk_r)
            xc = x_ref[pl.ds(r0, chunk_r), :].astype(jnp.float32)
            yc = y_ref[pl.ds(r0, chunk_r), :].astype(jnp.float32)
            if masked:
                rid = (block_start + r0) + lax.broadcasted_iota(
                    jnp.int32, (chunk_r, LANES), 0)
                m = rid < valid_rows
                xc = jnp.where(m, xc, 0.0)
                yc = jnp.where(m, yc, 0.0)
            d = xc - yc
            return (acc[0] + fold(xc),
                    acc[1] + fold(yc),
                    acc[2] + fold(xc * xc),
                    acc[3] + fold(yc * yc),
                    acc[4] + fold(xc * yc),
                    acc[5] + fold(d * d))

        z = jnp.zeros((SUBLANES, LANES), jnp.float32)
        acc = lax.fori_loop(0, n_chunks, body, (z, z, z, z, z, z))
        # Scratch is read+written once per grid step, not per chunk/element.
        for r, a in zip(acc_refs, acc):
            r[...] += a

    fully_in_bounds = block_start + block_r <= valid_rows

    @pl.when(fully_in_bounds)
    def _():
        chunk_loop(masked=False)        # fast path: no iota/select cost

    @pl.when(jnp.logical_not(fully_in_bounds))
    def _():
        chunk_loop(masked=True)         # edge tiles only

    @pl.when(t == last_t)
    def _():
        for k, r in enumerate(acc_refs):
            o_ref[0, k] = r[...]


def icmse_loss(x, y, mse_coef=1.0):
    """Pallas TPU implementation of ICMSELoss.forward; returns a scalar."""
    xf = x.reshape(-1)
    yf = y.reshape(-1)
    assert xf.shape == yf.shape, "x and y must have the same number of elements"
    n = xf.shape[0]

    # Zero-pad only when numel is not lane-aligned (rare); padded zeros
    # contribute exactly 0 to every partial sum, so n stays the true count.
    n_pad = _round_up(n, LANES)
    if n_pad != n:
        # TODO(synk): fully copy-free path for numel % 128 != 0 (feed the <128
        # element tail via SMEM) — skipped, this case is rare.
        xf = jnp.pad(xf, (0, n_pad - n))
        yf = jnp.pad(yf, (0, n_pad - n))
    rows = n_pad // LANES
    x2 = xf.reshape(rows, LANES)               # bitcast; keep HBM dtype
    y2 = yf.reshape(rows, LANES)

    if rows <= CHUNK_R:
        block_r = _round_up(rows, SUBLANES)    # single small chunk
        chunk_r = block_r
    else:
        block_r = min(TILE_R, _round_up(rows, CHUNK_R))
        chunk_r = CHUNK_R

    total_blocks = (rows + block_r - 1) // block_r
    bpc = (total_blocks + NCORES - 1) // NCORES     # row-blocks per core
    max_block = total_blocks - 1

    def in_map(c, t):
        # Clamp so the DMA window always overlaps the array; ghost tiles of
        # the second core are zeroed by the logical row mask in-kernel.
        return (jnp.minimum(c * bpc + t, max_block), 0)

    kernel = functools.partial(
        _icmse_partial_kernel,
        bpc=bpc, block_r=block_r, chunk_r=chunk_r, valid_rows=rows)

    partials = pl.pallas_call(
        kernel,
        out_shape=jax.ShapeDtypeStruct((NCORES, 6, SUBLANES, LANES), jnp.float32),
        grid_spec=pltpu.PrefetchScalarGridSpec(
            num_scalar_prefetch=0,
            grid=(NCORES, bpc),
            in_specs=[
                pl.BlockSpec((block_r, LANES), in_map),
                pl.BlockSpec((block_r, LANES), in_map),
            ],
            out_specs=pl.BlockSpec((1, 6, SUBLANES, LANES),
                                   lambda c, t: (c, 0, 0, 0)),
            scratch_shapes=[pltpu.VMEM((SUBLANES, LANES), jnp.float32)] * 6,
        ),
        compiler_params=pltpu.CompilerParams(
            dimension_semantics=("parallel", "arbitrary"),
            vmem_limit_bytes=VMEM_LIMIT_BYTES),
    )(x2, y2)

    # Tiny epilogue in plain JAX (also merges the two per-core partials).
    sums = jnp.sum(partials, axis=(0, 2, 3))        # (6,)
    sx, sy, sxx, syy, sxy, sd2 = (sums[i] for i in range(6))

    n_f = jnp.float32(n)
    inv_n = 1.0 / n_f
    mse = sd2 * inv_n                                # mean((x-y)^2), no cancellation
    mx = sx * inv_n
    my = sy * inv_n
    cov = sxy * inv_n - mx * my                      # mean((x-mx)*(y-my))
    bessel = n_f / (n_f - 1.0)                       # torch.std is unbiased (ddof=1)
    var_x = jnp.maximum(sxx * inv_n - mx * mx, 0.0) * bessel
    var_y = jnp.maximum(syy * inv_n - my * my, 0.0) * bessel
    ic = cov / jnp.sqrt(var_x * var_y)
    return ic + jnp.float32(mse_coef) * mse


def icmse_loss_ref(x, y, mse_coef=1.0):
    """Pure-JAX reference matching the PyTorch forward exactly."""
    x = x.astype(jnp.float32)
    y = y.astype(jnp.float32)
    mse = jnp.mean((x - y) ** 2)
    xc = x - jnp.mean(x)
    yc = y - jnp.mean(y)
    return (jnp.mean(xc * yc) / (jnp.std(xc, ddof=1) * jnp.std(yc, ddof=1))
            + mse_coef * mse)


if __name__ == "__main__":
    key = jax.random.PRNGKey(0)
    kx, ky = jax.random.split(key)
    # Small NCHW-like inputs: batch=2, channels=4, spatial=16x16
    x = jax.random.normal(kx, (2, 4, 16, 16), dtype=jnp.float32) * 0.2
    y = jax.random.normal(ky, (2, 4, 16, 16), dtype=jnp.float32) * 0.2

    out = icmse_loss(x, y)
    jax.block_until_ready(out)

    ref = icmse_loss_ref(x, y)
    assert jnp.allclose(out, ref, rtol=1e-4, atol=1e-5), (out, ref)
    print("KERNEL_OK")
</pallas_src>

<mosaic_0001>
module attributes {stable_mosaic.version = 11 : i64} {
  func.func @_icmse_partial_kernel(%arg0: i32, %arg1: i32, %arg2: memref<16x128xf32, #tpu.memory_space<vmem>>, %arg3: memref<16x128xf32, #tpu.memory_space<vmem>>, %arg4: memref<1x6x8x128xf32, #tpu.memory_space<vmem>>, %arg5: memref<8x128xf32, #tpu.memory_space<vmem>>, %arg6: memref<8x128xf32, #tpu.memory_space<vmem>>, %arg7: memref<8x128xf32, #tpu.memory_space<vmem>>, %arg8: memref<8x128xf32, #tpu.memory_space<vmem>>, %arg9: memref<8x128xf32, #tpu.memory_space<vmem>>, %arg10: memref<8x128xf32, #tpu.memory_space<vmem>>) attributes {dimension_semantics = [#tpu.dimension_semantics<parallel>, #tpu.dimension_semantics<arbitrary>], iteration_bounds = array<i64: 2, 1>, scalar_prefetch = 0 : i64, scratch_operands = 6 : i64, tpu.core_type = #tpu.core_type<tc>, window_params = [{transform_indices = @transform_0, window_bounds = array<i64: 16, 128>}, {transform_indices = @transform_1, window_bounds = array<i64: 16, 128>}, {transform_indices = @transform_2, window_bounds = array<i64: 1, 6, 8, 128>}]} {
    %c0_i32 = arith.constant 0 : i32
    %0 = arith.cmpi eq, %arg1, %c0_i32 : i32
    %1 = arith.extui %0 : i1 to i32
    %c0_i32_0 = arith.constant 0 : i32
    %2 = arith.cmpi ne, %1, %c0_i32_0 : i32
    scf.if %2 {
      %cst = arith.constant 0.000000e+00 : f32
      %16 = vector.broadcast %cst : f32 to vector<8x128xf32>
      %c0 = arith.constant 0 : index
      %c0_7 = arith.constant 0 : index
      %17 = vector.load %arg5[%c0, %c0_7] : memref<8x128xf32, #tpu.memory_space<vmem>>, vector<8x128xf32>
      tpu.vector_store %arg5[%c0, %c0_7], %16 {strides = array<i32>} : memref<8x128xf32, #tpu.memory_space<vmem>>, vector<8x128xf32>,
      %cst_8 = arith.constant 0.000000e+00 : f32
      %18 = vector.broadcast %cst_8 : f32 to vector<8x128xf32>
      %c0_9 = arith.constant 0 : index
      %c0_10 = arith.constant 0 : index
      %19 = vector.load %arg6[%c0_9, %c0_10] : memref<8x128xf32, #tpu.memory_space<vmem>>, vector<8x128xf32>
      tpu.vector_store %arg6[%c0_9, %c0_10], %18 {strides = array<i32>} : memref<8x128xf32, #tpu.memory_space<vmem>>, vector<8x128xf32>,
      %cst_11 = arith.constant 0.000000e+00 : f32
      %20 = vector.broadcast %cst_11 : f32 to vector<8x128xf32>
      %c0_12 = arith.constant 0 : index
      %c0_13 = arith.constant 0 : index
      %21 = vector.load %arg7[%c0_12, %c0_13] : memref<8x128xf32, #tpu.memory_space<vmem>>, vector<8x128xf32>
      tpu.vector_store %arg7[%c0_12, %c0_13], %20 {strides = array<i32>} : memref<8x128xf32, #tpu.memory_space<vmem>>, vector<8x128xf32>,
      %cst_14 = arith.constant 0.000000e+00 : f32
      %22 = vector.broadcast %cst_14 : f32 to vector<8x128xf32>
      %c0_15 = arith.constant 0 : index
      %c0_16 = arith.constant 0 : index
      %23 = vector.load %arg8[%c0_15, %c0_16] : memref<8x128xf32, #tpu.memory_space<vmem>>, vector<8x128xf32>
      tpu.vector_store %arg8[%c0_15, %c0_16], %22 {strides = array<i32>} : memref<8x128xf32, #tpu.memory_space<vmem>>, vector<8x128xf32>,
      %cst_17 = arith.constant 0.000000e+00 : f32
      %24 = vector.broadcast %cst_17 : f32 to vector<8x128xf32>
      %c0_18 = arith.constant 0 : index
      %c0_19 = arith.constant 0 : index
      %25 = vector.load %arg9[%c0_18, %c0_19] : memref<8x128xf32, #tpu.memory_space<vmem>>, vector<8x128xf32>
      tpu.vector_store %arg9[%c0_18, %c0_19], %24 {strides = array<i32>} : memref<8x128xf32, #tpu.memory_space<vmem>>, vector<8x128xf32>,
      %cst_20 = arith.constant 0.000000e+00 : f32
      %26 = vector.broadcast %cst_20 : f32 to vector<8x128xf32>
      %c0_21 = arith.constant 0 : index
      %c0_22 = arith.constant 0 : index
      %27 = vector.load %arg10[%c0_21, %c0_22] : memref<8x128xf32, #tpu.memory_space<vmem>>, vector<8x128xf32>
      tpu.vector_store %arg10[%c0_21, %c0_22], %26 {strides = array<i32>} : memref<8x128xf32, #tpu.memory_space<vmem>>, vector<8x128xf32>,
    } else {
    }
    %c1_i32 = arith.constant 1 : i32
    %3 = arith.muli %arg0, %c1_i32 : i32
    %4 = arith.addi %3, %arg1 : i32
    %c16_i32 = arith.constant 16 : i32
    %5 = arith.muli %4, %c16_i32 : i32
    %c16_i32_1 = arith.constant 16 : i32
    %6 = arith.addi %5, %c16_i32_1 : i32
    %c16_i32_2 = arith.constant 16 : i32
    %7 = arith.cmpi sle, %6, %c16_i32_2 : i32
    %8 = arith.extui %7 : i1 to i32
    %c0_i32_3 = arith.constant 0 : i32
    %9 = arith.cmpi ne, %8, %c0_i32_3 : i32
    scf.if %9 {
      %cst = arith.constant 0.000000e+00 : f32
      %16 = vector.broadcast %cst : f32 to vector<8x128xf32>
      %c0_i32_7 = arith.constant 0 : i32
      %c16_i32_8 = arith.constant 16 : i32
      %17 = arith.muli %c0_i32_7, %c16_i32_8 : i32
      %18 = tpu.assume_multiple %17, 16 : i32
      %19 = arith.index_cast %18 : i32 to index
      %c0 = arith.constant 0 : index
      %20 = vector.load %arg2[%19, %c0] : memref<16x128xf32, #tpu.memory_space<vmem>>, vector<16x128xf32>
      %21 = arith.index_cast %18 : i32 to index
      %c0_9 = arith.constant 0 : index
      %22 = vector.load %arg3[%21, %c0_9] : memref<16x128xf32, #tpu.memory_space<vmem>>, vector<16x128xf32>
      %23 = arith.subf %20, %22 : vector<16x128xf32>
      %24 = vector.shape_cast %20 : vector<16x128xf32> to vector<2x8x128xf32>
      %cst_10 = arith.constant dense<0.000000e+00> : vector<8x128xf32>
      %25 = vector.multi_reduction <add>, %24, %cst_10 [0] : vector<2x8x128xf32> to vector<8x128xf32>
      %26 = arith.addf %16, %25 : vector<8x128xf32>
      %27 = vector.shape_cast %22 : vector<16x128xf32> to vector<2x8x128xf32>
      %cst_11 = arith.constant dense<0.000000e+00> : vector<8x128xf32>
      %28 = vector.multi_reduction <add>, %27, %cst_11 [0] : vector<2x8x128xf32> to vector<8x128xf32>
      %29 = arith.addf %16, %28 : vector<8x128xf32>
      %30 = arith.mulf %20, %20 : vector<16x128xf32>
      %31 = vector.shape_cast %30 : vector<16x128xf32> to vector<2x8x128xf32>
      %cst_12 = arith.constant dense<0.000000e+00> : vector<8x128xf32>
      %32 = vector.multi_reduction <add>, %31, %cst_12 [0] : vector<2x8x128xf32> to vector<8x128xf32>
      %33 = arith.addf %16, %32 : vector<8x128xf32>
      %34 = arith.mulf %22, %22 : vector<16x128xf32>
      %35 = vector.shape_cast %34 : vector<16x128xf32> to vector<2x8x128xf32>
      %cst_13 = arith.constant dense<0.000000e+00> : vector<8x128xf32>
      %36 = vector.multi_reduction <add>, %35, %cst_13 [0] : vector<2x8x128xf32> to vector<8x128xf32>
      %37 = arith.addf %16, %36 : vector<8x128xf32>
      %38 = arith.mulf %20, %22 : vector<16x128xf32>
      %39 = vector.shape_cast %38 : vector<16x128xf32> to vector<2x8x128xf32>
      %cst_14 = arith.constant dense<0.000000e+00> : vector<8x128xf32>
      %40 = vector.multi_reduction <add>, %39, %cst_14 [0] : vector<2x8x128xf32> to vector<8x128xf32>
      %41 = arith.addf %16, %40 : vector<8x128xf32>
      %42 = arith.mulf %23, %23 : vector<16x128xf32>
      %43 = vector.shape_cast %42 : vector<16x128xf32> to vector<2x8x128xf32>
      %cst_15 = arith.constant dense<0.000000e+00> : vector<8x128xf32>
      %44 = vector.multi_reduction <add>, %43, %cst_15 [0] : vector<2x8x128xf32> to vector<8x128xf32>
      %45 = arith.addf %16, %44 : vector<8x128xf32>
      %c1_i32_16 = arith.constant 1 : i32
      %c0_17 = arith.constant 0 : index
      %c0_18 = arith.constant 0 : index
      %46 = vector.load %arg5[%c0_17, %c0_18] : memref<8x128xf32, #tpu.memory_space<vmem>>, vector<8x128xf32>
      %47 = arith.addf %46, %26 : vector<8x128xf32>
      %c0_19 = arith.constant 0 : index
      %c0_20 = arith.constant 0 : index
      %48 = vector.load %arg5[%c0_19, %c0_20] : memref<8x128xf32, #tpu.memory_space<vmem>>, vector<8x128xf32>
      tpu.vector_store %arg5[%c0_19, %c0_20], %47 {strides = array<i32>} : memref<8x128xf32, #tpu.memory_space<vmem>>, vector<8x128xf32>,
      %c0_21 = arith.constant 0 : index
      %c0_22 = arith.constant 0 : index
      %49 = vector.load %arg6[%c0_21, %c0_22] : memref<8x128xf32, #tpu.memory_space<vmem>>, vector<8x128xf32>
      %50 = arith.addf %49, %29 : vector<8x128xf32>
      %c0_23 = arith.constant 0 : index
      %c0_24 = arith.constant 0 : index
      %51 = vector.load %arg6[%c0_23, %c0_24] : memref<8x128xf32, #tpu.memory_space<vmem>>, vector<8x128xf32>
      tpu.vector_store %arg6[%c0_23, %c0_24], %50 {strides = array<i32>} : memref<8x128xf32, #tpu.memory_space<vmem>>, vector<8x128xf32>,
      %c0_25 = arith.constant 0 : index
      %c0_26 = arith.constant 0 : index
      %52 = vector.load %arg7[%c0_25, %c0_26] : memref<8x128xf32, #tpu.memory_space<vmem>>, vector<8x128xf32>
      %53 = arith.addf %52, %33 : vector<8x128xf32>
      %c0_27 = arith.constant 0 : index
      %c0_28 = arith.constant 0 : index
      %54 = vector.load %arg7[%c0_27, %c0_28] : memref<8x128xf32, #tpu.memory_space<vmem>>, vector<8x128xf32>
      tpu.vector_store %arg7[%c0_27, %c0_28], %53 {strides = array<i32>} : memref<8x128xf32, #tpu.memory_space<vmem>>, vector<8x128xf32>,
      %c0_29 = arith.constant 0 : index
      %c0_30 = arith.constant 0 : index
      %55 = vector.load %arg8[%c0_29, %c0_30] : memref<8x128xf32, #tpu.memory_space<vmem>>, vector<8x128xf32>
      %56 = arith.addf %55, %37 : vector<8x128xf32>
      %c0_31 = arith.constant 0 : index
      %c0_32 = arith.constant 0 : index
      %57 = vector.load %arg8[%c0_31, %c0_32] : memref<8x128xf32, #tpu.memory_space<vmem>>, vector<8x128xf32>
      tpu.vector_store %arg8[%c0_31, %c0_32], %56 {strides = array<i32>} : memref<8x128xf32, #tpu.memory_space<vmem>>, vector<8x128xf32>,
      %c0_33 = arith.constant 0 : index
      %c0_34 = arith.constant 0 : index
      %58 = vector.load %arg9[%c0_33, %c0_34] : memref<8x128xf32, #tpu.memory_space<vmem>>, vector<8x128xf32>
      %59 = arith.addf %58, %41 : vector<8x128xf32>
      %c0_35 = arith.constant 0 : index
      %c0_36 = arith.constant 0 : index
      %60 = vector.load %arg9[%c0_35, %c0_36] : memref<8x128xf32, #tpu.memory_space<vmem>>, vector<8x128xf32>
      tpu.vector_store %arg9[%c0_35, %c0_36], %59 {strides = array<i32>} : memref<8x128xf32, #tpu.memory_space<vmem>>, vector<8x128xf32>,
      %c0_37 = arith.constant 0 : index
      %c0_38 = arith.constant 0 : index
      %61 = vector.load %arg10[%c0_37, %c0_38] : memref<8x128xf32, #tpu.memory_space<vmem>>, vector<8x128xf32>
      %62 = arith.addf %61, %45 : vector<8x128xf32>
      %c0_39 = arith.constant 0 : index
      %c0_40 = arith.constant 0 : index
      %63 = vector.load %arg10[%c0_39, %c0_40] : memref<8x128xf32, #tpu.memory_space<vmem>>, vector<8x128xf32>
      tpu.vector_store %arg10[%c0_39, %c0_40], %62 {strides = array<i32>} : memref<8x128xf32, #tpu.memory_space<vmem>>, vector<8x128xf32>,
    } else {
    }
    %true = arith.constant true
    %10 = arith.xori %7, %true : i1
    %11 = arith.extui %10 : i1 to i32
    %c0_i32_4 = arith.constant 0 : i32
    %12 = arith.cmpi ne, %11, %c0_i32_4 : i32
    scf.if %12 {
      %cst = arith.constant 0.000000e+00 : f32
      %16 = vector.broadcast %cst : f32 to vector<8x128xf32>
      %c0_i32_7 = arith.constant 0 : i32
      %c16_i32_8 = arith.constant 16 : i32
      %17 = arith.muli %c0_i32_7, %c16_i32_8 : i32
      %18 = tpu.assume_multiple %17, 16 : i32
      %19 = arith.index_cast %18 : i32 to index
      %c0 = arith.constant 0 : index
      %20 = vector.load %arg2[%19, %c0] : memref<16x128xf32, #tpu.memory_space<vmem>>, vector<16x128xf32>
      %21 = arith.index_cast %18 : i32 to index
      %c0_9 = arith.constant 0 : index
      %22 = vector.load %arg3[%21, %c0_9] : memref<16x128xf32, #tpu.memory_space<vmem>>, vector<16x128xf32>
      %23 = arith.addi %5, %18 : i32
      %24 = tpu.iota {dimensions = array<i32: 0>} : vector<16x128xi32>
      %25 = vector.broadcast %23 : i32 to vector<16x128xi32>
      %26 = arith.addi %25, %24 : vector<16x128xi32>
      %c16_i32_10 = arith.constant 16 : i32
      %27 = vector.broadcast %c16_i32_10 : i32 to vector<16x128xi32>
      %28 = arith.cmpi slt, %26, %27 : vector<16x128xi32>
      %cst_11 = arith.constant 0.000000e+00 : f32
      %29 = vector.broadcast %cst_11 : f32 to vector<16x128xf32>
      %30 = arith.select %28, %20, %29 : vector<16x128xi1>, vector<16x128xf32>
      %cst_12 = arith.constant 0.000000e+00 : f32
      %31 = vector.broadcast %cst_12 : f32 to vector<16x128xf32>
      %32 = arith.select %28, %22, %31 : vector<16x128xi1>, vector<16x128xf32>
      %33 = arith.subf %30, %32 : vector<16x128xf32>
      %34 = vector.shape_cast %30 : vector<16x128xf32> to vector<2x8x128xf32>
      %cst_13 = arith.constant dense<0.000000e+00> : vector<8x128xf32>
      %35 = vector.multi_reduction <add>, %34, %cst_13 [0] : vector<2x8x128xf32> to vector<8x128xf32>
      %36 = arith.addf %16, %35 : vector<8x128xf32>
      %37 = vector.shape_cast %32 : vector<16x128xf32> to vector<2x8x128xf32>
      %cst_14 = arith.constant dense<0.000000e+00> : vector<8x128xf32>
      %38 = vector.multi_reduction <add>, %37, %cst_14 [0] : vector<2x8x128xf32> to vector<8x128xf32>
      %39 = arith.addf %16, %38 : vector<8x128xf32>
      %40 = arith.mulf %30, %30 : vector<16x128xf32>
      %41 = vector.shape_cast %40 : vector<16x128xf32> to vector<2x8x128xf32>
      %cst_15 = arith.constant dense<0.000000e+00> : vector<8x128xf32>
      %42 = vector.multi_reduction <add>, %41, %cst_15 [0] : vector<2x8x128xf32> to vector<8x128xf32>
      %43 = arith.addf %16, %42 : vector<8x128xf32>
      %44 = arith.mulf %32, %32 : vector<16x128xf32>
      %45 = vector.shape_cast %44 : vector<16x128xf32> to vector<2x8x128xf32>
      %cst_16 = arith.constant dense<0.000000e+00> : vector<8x128xf32>
      %46 = vector.multi_reduction <add>, %45, %cst_16 [0] : vector<2x8x128xf32> to vector<8x128xf32>
      %47 = arith.addf %16, %46 : vector<8x128xf32>
      %48 = arith.mulf %30, %32 : vector<16x128xf32>
      %49 = vector.shape_cast %48 : vector<16x128xf32> to vector<2x8x128xf32>
      %cst_17 = arith.constant dense<0.000000e+00> : vector<8x128xf32>
      %50 = vector.multi_reduction <add>, %49, %cst_17 [0] : vector<2x8x128xf32> to vector<8x128xf32>
      %51 = arith.addf %16, %50 : vector<8x128xf32>
      %52 = arith.mulf %33, %33 : vector<16x128xf32>
      %53 = vector.shape_cast %52 : vector<16x128xf32> to vector<2x8x128xf32>
      %cst_18 = arith.constant dense<0.000000e+00> : vector<8x128xf32>
      %54 = vector.multi_reduction <add>, %53, %cst_18 [0] : vector<2x8x128xf32> to vector<8x128xf32>
      %55 = arith.addf %16, %54 : vector<8x128xf32>
      %c1_i32_19 = arith.constant 1 : i32
      %c0_20 = arith.constant 0 : index
      %c0_21 = arith.constant 0 : index
      %56 = vector.load %arg5[%c0_20, %c0_21] : memref<8x128xf32, #tpu.memory_space<vmem>>, vector<8x128xf32>
      %57 = arith.addf %56, %36 : vector<8x128xf32>
      %c0_22 = arith.constant 0 : index
      %c0_23 = arith.constant 0 : index
      %58 = vector.load %arg5[%c0_22, %c0_23] : memref<8x128xf32, #tpu.memory_space<vmem>>, vector<8x128xf32>
      tpu.vector_store %arg5[%c0_22, %c0_23], %57 {strides = array<i32>} : memref<8x128xf32, #tpu.memory_space<vmem>>, vector<8x128xf32>,
      %c0_24 = arith.constant 0 : index
      %c0_25 = arith.constant 0 : index
      %59 = vector.load %arg6[%c0_24, %c0_25] : memref<8x128xf32, #tpu.memory_space<vmem>>, vector<8x128xf32>
      %60 = arith.addf %59, %39 : vector<8x128xf32>
      %c0_26 = arith.constant 0 : index
      %c0_27 = arith.constant 0 : index
      %61 = vector.load %arg6[%c0_26, %c0_27] : memref<8x128xf32, #tpu.memory_space<vmem>>, vector<8x128xf32>
      tpu.vector_store %arg6[%c0_26, %c0_27], %60 {strides = array<i32>} : memref<8x128xf32, #tpu.memory_space<vmem>>, vector<8x128xf32>,
      %c0_28 = arith.constant 0 : index
      %c0_29 = arith.constant 0 : index
      %62 = vector.load %arg7[%c0_28, %c0_29] : memref<8x128xf32, #tpu.memory_space<vmem>>, vector<8x128xf32>
      %63 = arith.addf %62, %43 : vector<8x128xf32>
      %c0_30 = arith.constant 0 : index
      %c0_31 = arith.constant 0 : index
      %64 = vector.load %arg7[%c0_30, %c0_31] : memref<8x128xf32, #tpu.memory_space<vmem>>, vector<8x128xf32>
      tpu.vector_store %arg7[%c0_30, %c0_31], %63 {strides = array<i32>} : memref<8x128xf32, #tpu.memory_space<vmem>>, vector<8x128xf32>,
      %c0_32 = arith.constant 0 : index
      %c0_33 = arith.constant 0 : index
      %65 = vector.load %arg8[%c0_32, %c0_33] : memref<8x128xf32, #tpu.memory_space<vmem>>, vector<8x128xf32>
      %66 = arith.addf %65, %47 : vector<8x128xf32>
      %c0_34 = arith.constant 0 : index
      %c0_35 = arith.constant 0 : index
      %67 = vector.load %arg8[%c0_34, %c0_35] : memref<8x128xf32, #tpu.memory_space<vmem>>, vector<8x128xf32>
      tpu.vector_store %arg8[%c0_34, %c0_35], %66 {strides = array<i32>} : memref<8x128xf32, #tpu.memory_space<vmem>>, vector<8x128xf32>,
      %c0_36 = arith.constant 0 : index
      %c0_37 = arith.constant 0 : index
      %68 = vector.load %arg9[%c0_36, %c0_37] : memref<8x128xf32, #tpu.memory_space<vmem>>, vector<8x128xf32>
      %69 = arith.addf %68, %51 : vector<8x128xf32>
      %c0_38 = arith.constant 0 : index
      %c0_39 = arith.constant 0 : index
      %70 = vector.load %arg9[%c0_38, %c0_39] : memref<8x128xf32, #tpu.memory_space<vmem>>, vector<8x128xf32>
      tpu.vector_store %arg9[%c0_38, %c0_39], %69 {strides = array<i32>} : memref<8x128xf32, #tpu.memory_space<vmem>>, vector<8x128xf32>,
      %c0_40 = arith.constant 0 : index
      %c0_41 = arith.constant 0 : index
      %71 = vector.load %arg10[%c0_40, %c0_41] : memref<8x128xf32, #tpu.memory_space<vmem>>, vector<8x128xf32>
      %72 = arith.addf %71, %55 : vector<8x128xf32>
      %c0_42 = arith.constant 0 : index
      %c0_43 = arith.constant 0 : index
      %73 = vector.load %arg10[%c0_42, %c0_43] : memref<8x128xf32, #tpu.memory_space<vmem>>, vector<8x128xf32>
      tpu.vector_store %arg10[%c0_42, %c0_43], %72 {strides = array<i32>} : memref<8x128xf32, #tpu.memory_space<vmem>>, vector<8x128xf32>,
    } else {
    }
    %c0_i32_5 = arith.constant 0 : i32
    %13 = arith.cmpi eq, %arg1, %c0_i32_5 : i32
    %14 = arith.extui %13 : i1 to i32
    %c0_i32_6 = arith.constant 0 : i32
    %15 = arith.cmpi ne, %14, %c0_i32_6 : i32
    scf.if %15 {
      %c0 = arith.constant 0 : index
      %c0_7 = arith.constant 0 : index
      %16 = vector.load %arg5[%c0, %c0_7] : memref<8x128xf32, #tpu.memory_space<vmem>>, vector<8x128xf32>
      %c0_8 = arith.constant 0 : index
      %c0_9 = arith.constant 0 : index
      %c0_10 = arith.constant 0 : index
      %c0_11 = arith.constant 0 : index
      %17 = vector.load %arg4[%c0_8, %c0_9, %c0_10, %c0_11] : memref<1x6x8x128xf32, #tpu.memory_space<vmem>>, vector<1x1x8x128xf32>
      %18 = vector.shape_cast %17 : vector<1x1x8x128xf32> to vector<8x128xf32>
      %19 = vector.shape_cast %16 : vector<8x128xf32> to vector<1x1x8x128xf32>
      tpu.vector_store %arg4[%c0_8, %c0_9, %c0_10, %c0_11], %19 {strides = array<i32>} : memref<1x6x8x128xf32, #tpu.memory_space<vmem>>, vector<1x1x8x128xf32>,
      %c0_12 = arith.constant 0 : index
      %c0_13 = arith.constant 0 : index
      %20 = vector.load %arg6[%c0_12, %c0_13] : memref<8x128xf32, #tpu.memory_space<vmem>>, vector<8x128xf32>
      %c0_14 = arith.constant 0 : index
      %c1 = arith.constant 1 : index
      %c0_15 = arith.constant 0 : index
      %c0_16 = arith.constant 0 : index
      %21 = vector.load %arg4[%c0_14, %c1, %c0_15, %c0_16] : memref<1x6x8x128xf32, #tpu.memory_space<vmem>>, vector<1x1x8x128xf32>
      %22 = vector.shape_cast %21 : vector<1x1x8x128xf32> to vector<8x128xf32>
      %23 = vector.shape_cast %20 : vector<8x128xf32> to vector<1x1x8x128xf32>
      tpu.vector_store %arg4[%c0_14, %c1, %c0_15, %c0_16], %23 {strides = array<i32>} : memref<1x6x8x128xf32, #tpu.memory_space<vmem>>, vector<1x1x8x128xf32>,
      %c0_17 = arith.constant 0 : index
      %c0_18 = arith.constant 0 : index
      %24 = vector.load %arg7[%c0_17, %c0_18] : memref<8x128xf32, #tpu.memory_space<vmem>>, vector<8x128xf32>
      %c0_19 = arith.constant 0 : index
      %c2 = arith.constant 2 : index
      %c0_20 = arith.constant 0 : index
      %c0_21 = arith.constant 0 : index
      %25 = vector.load %arg4[%c0_19, %c2, %c0_20, %c0_21] : memref<1x6x8x128xf32, #tpu.memory_space<vmem>>, vector<1x1x8x128xf32>
      %26 = vector.shape_cast %25 : vector<1x1x8x128xf32> to vector<8x128xf32>
      %27 = vector.shape_cast %24 : vector<8x128xf32> to vector<1x1x8x128xf32>
      tpu.vector_store %arg4[%c0_19, %c2, %c0_20, %c0_21], %27 {strides = array<i32>} : memref<1x6x8x128xf32, #tpu.memory_space<vmem>>, vector<1x1x8x128xf32>,
      %c0_22 = arith.constant 0 : index
      %c0_23 = arith.constant 0 : index
      %28 = vector.load %arg8[%c0_22, %c0_23] : memref<8x128xf32, #tpu.memory_space<vmem>>, vector<8x128xf32>
      %c0_24 = arith.constant 0 : index
      %c3 = arith.constant 3 : index
      %c0_25 = arith.constant 0 : index
      %c0_26 = arith.constant 0 : index
      %29 = vector.load %arg4[%c0_24, %c3, %c0_25, %c0_26] : memref<1x6x8x128xf32, #tpu.memory_space<vmem>>, vector<1x1x8x128xf32>
      %30 = vector.shape_cast %29 : vector<1x1x8x128xf32> to vector<8x128xf32>
      %31 = vector.shape_cast %28 : vector<8x128xf32> to vector<1x1x8x128xf32>
      tpu.vector_store %arg4[%c0_24, %c3, %c0_25, %c0_26], %31 {strides = array<i32>} : memref<1x6x8x128xf32, #tpu.memory_space<vmem>>, vector<1x1x8x128xf32>,
      %c0_27 = arith.constant 0 : index
      %c0_28 = arith.constant 0 : index
      %32 = vector.load %arg9[%c0_27, %c0_28] : memref<8x128xf32, #tpu.memory_space<vmem>>, vector<8x128xf32>
      %c0_29 = arith.constant 0 : index
      %c4 = arith.constant 4 : index
      %c0_30 = arith.constant 0 : index
      %c0_31 = arith.constant 0 : index
      %33 = vector.load %arg4[%c0_29, %c4, %c0_30, %c0_31] : memref<1x6x8x128xf32, #tpu.memory_space<vmem>>, vector<1x1x8x128xf32>
      %34 = vector.shape_cast %33 : vector<1x1x8x128xf32> to vector<8x128xf32>
      %35 = vector.shape_cast %32 : vector<8x128xf32> to vector<1x1x8x128xf32>
      tpu.vector_store %arg4[%c0_29, %c4, %c0_30, %c0_31], %35 {strides = array<i32>} : memref<1x6x8x128xf32, #tpu.memory_space<vmem>>, vector<1x1x8x128xf32>,
      %c0_32 = arith.constant 0 : index
      %c0_33 = arith.constant 0 : index
      %36 = vector.load %arg10[%c0_32, %c0_33] : memref<8x128xf32, #tpu.memory_space<vmem>>, vector<8x128xf32>
      %c0_34 = arith.constant 0 : index
      %c5 = arith.constant 5 : index
      %c0_35 = arith.constant 0 : index
      %c0_36 = arith.constant 0 : index
      %37 = vector.load %arg4[%c0_34, %c5, %c0_35, %c0_36] : memref<1x6x8x128xf32, #tpu.memory_space<vmem>>, vector<1x1x8x128xf32>
      %38 = vector.shape_cast %37 : vector<1x1x8x128xf32> to vector<8x128xf32>
      %39 = vector.shape_cast %36 : vector<8x128xf32> to vector<1x1x8x128xf32>
      tpu.vector_store %arg4[%c0_34, %c5, %c0_35, %c0_36], %39 {strides = array<i32>} : memref<1x6x8x128xf32, #tpu.memory_space<vmem>>, vector<1x1x8x128xf32>,
    } else {
    }
    return
  }
  func.func @transform_0(%arg0: i32, %arg1: i32) -> (i32, i32) {
    %c1_i32 = arith.constant 1 : i32
    %0 = arith.muli %arg0, %c1_i32 : i32
    %1 = arith.addi %0, %arg1 : i32
    %c0_i32 = arith.constant 0 : i32
    %2 = arith.minsi %1, %c0_i32 : i32
    %c0_i32_0 = arith.constant 0 : i32
    %c0_i32_1 = arith.constant 0 : i32
    return %2, %c0_i32_0 : i32, i32
  }
  func.func @transform_1(%arg0: i32, %arg1: i32) -> (i32, i32) {
    %c1_i32 = arith.constant 1 : i32
    %0 = arith.muli %arg0, %c1_i32 : i32
    %1 = arith.addi %0, %arg1 : i32
    %c0_i32 = arith.constant 0 : i32
    %2 = arith.minsi %1, %c0_i32 : i32
    %c0_i32_0 = arith.constant 0 : i32
    %c0_i32_1 = arith.constant 0 : i32
    return %2, %c0_i32_0 : i32, i32
  }
  func.func @transform_2(%arg0: i32, %arg1: i32) -> (i32, i32, i32, i32) {
    %c0_i32 = arith.constant 0 : i32
    %c0_i32_0 = arith.constant 0 : i32
    %c0_i32_1 = arith.constant 0 : i32
    %c0_i32_2 = arith.constant 0 : i32
    return %arg0, %c0_i32, %c0_i32_0, %c0_i32_1 : i32, i32, i32, i32
  }
}

</mosaic_0001>

<bundles_post_ra>
// kernel: tpu_custom_call.1
= control target key start
LH: loop header
LB: loop body
LE: loop exit
PB: predicated region body
PF: predicated region fallthrough
CT: control target
= control target key end

     0   :  { %7 = vsyncpa [#allocation9], 0  ;;  %s1056_s0 = inlined_call_operand.hbm [shape: f32[16,128], index: 0, kind: input, shape index: {}]   ;;  %s1057_s1 = inlined_call_operand.hbm [shape: f32[16,128], index: 1, kind: input, shape index: {}]   ;;  %s1058_s2 = inlined_call_operand.hbm [shape: f32[2,6,8,128], index: 2, kind: output, shape index: {}]  }
   0x1   :  { %9 = vsyncpa [#allocation9 + $0x1], 0 }
   0x2   :  { %10 = vsyncpa [#allocation12], 0 }
   0x3   :  { %12 = vsyncpa [#allocation12 + $0x1], 0 }
   0x4   :  { %13 = vsyncpa [#allocation10], 0 }
   0x5   :  { %15 = vsyncpa [#allocation10 + $0x1], 0  ;;  %s816_s9 = smov 0   ;;  %s818_s10 = smov 0  }
   0x6   :  { %s820_s11 = smov 0   ;;  %s822_s12 = smov 0  }
   0x7   :  { %s824_s13 = smov 0   ;;  %s826_s14 = smov 0  }
   0x8   :  { %s828_s15 = smov 0   ;;  %s830_s16 = smov 0  }
   0x9 LB: > { %s500_s17 = sadd.s32 4294967295, %s791_s16   ;;  %s501_s18 = sadd.s32 4294967294, %s791_s16   ;;  %s791_s16 = sphi %s830_s16, %s21_s16   ;;  %s787_s15 = sphi %s828_s15, %s1077_s15   ;;  %s783_s14 = sphi %s826_s14, %s1076_s14   ;;  %s779_s13 = sphi %s824_s13, %s1046_s13   ;;  %s775_s12 = sphi %s822_s12, %s1075_s12   ;;  %s771_s11 = sphi %s820_s11, %s1074_s11   ;;  %s767_s10 = sphi %s818_s10, %s1073_s10   ;;  %s763_s9 = sphi %s816_s9, %s1072_s9  }
   0xa   : > { %s33_s19 = sadd.s32 1, %s787_s15  ;;  %p760_p1 = scmp.ne.s32.totalorder %s779_s13, 0 }
   0xb   : > { %p35_p0 = scmp.ge.s32.totalorder %s33_s19, 2  ;;  %p54_p2 = scmp.eq.s32.totalorder %s791_s16, 0 }
   0xc   : > { %p59_p3 = scmp.ne.s32.totalorder %s779_s13, %s775_s12  ;;  %p60_p5 = scmp.eq.s32.totalorder %s500_s17, 0 }
   0xd   : > { %s1079_s19 = smov (%p35_p0, %s33_s19), 0  ;;  %p862_p4 = por %p760_p1, %p54_p2 }
   0xe   : > { %p866_p6 = por %p60_p5, %p59_p3  ;;  %s101_s22 = ssub.s32 %s787_s15, %s1079_s19 }
   0xf   : > { %p102_p7 = scmp.eq.s32.totalorder %s101_s22, 0  ;;  %s104_s23 = sadd.s32 1, %s771_s11 }
  0x10   : > { %s1062_s21 = scalar_select %p866_p6, 1, 0 }
  0x11   : > { %s874_s24 = scalar_select %p102_p7, %s771_s11, %s104_s23  }
  0x12   : > { %p114_p8 = scmp.ne.s32.totalorder %s771_s11, %s767_s10  ;;  %p115_p9 = scmp.eq.s32.totalorder %s500_s17, 1 }
  0x13   : > { %p120_p10 = scmp.ne.s32.totalorder %s767_s10, %s763_s9  ;;  %p121_p11 = scmp.eq.s32.totalorder %s501_s18, 1 }
  0x14   : > { %p880_p12 = por %p115_p9, %p114_p8  ;;  %p545_p1 = scmp.lt.s32.totalorder %s791_s16, 2 }
  0x15   : > { %p885_p0 = por %p121_p11, %p120_p10  ;;  %s793_s27 = smov [#allocation8]  }
  0x16   : > { %s1063_s25 = scalar_select %p880_p12, 1, 0 }
  0x17   : > { %s1064_s26 = scalar_select %p885_p0, 1, 0 }
  0x18   : > { %s155_s28 = sshll.u32 %s793_s27, 4  ;;  %p892_p2 = pnand %p545_p1, %p862_p4  ;;  %s156_s28 = int_to_ptr.vmem [resolvable:$true] %s155_s28 }
  0x19   : > { %s624_s4 = scalar_lea.hbm %s1056_s0, 256 }
  0x1a   : > { %p625_p3 = scmp.ne.s32.totalorder %s1056_s0, %s624_s4  ;;  %p626_p5 = pneg %p892_p2 }
  0x1b   : > { %p631_p8 = scmp.lt.u32.totalorder %s624_s4, %s624_s4  ;;  %p633_p9 = scmp.lt.u32.totalorder %s624_s4, %s1056_s0 }
  0x1c   : > { %p627_p7 = pnand %p626_p5, %p625_p3 }
  0x1d   : > { %p634_p10 = por %p633_p9, %p631_p8 }
  0x1e   : > { %p628_p4 = pneg %p627_p7 }
  0x20   : > { %p635_p11 = pnand %p634_p10, %p628_p4 }
  0x22   : > { %638 = shalt.err (!%p635_p11)
}
  0x23   : > { %s639_s12 = scalar_lea.vmem %s156_s28, 256  ;;  %s646_s17 = scalar_lea.vmem %s156_s28, 512 }
  0x24   : > { %p640_p1 = scmp.ne.s32.totalorder %s156_s28, %s639_s12  ;;  %p647_p12 = scmp.lt.s32.totalorder %s156_s28, %s156_s28 }
  0x25   : > { %p648_p6 = scmp.lt.s32.totalorder %s646_s17, %s639_s12 }
  0x26   : > { %p642_p13 = pnand %p640_p1, %p626_p5 }
  0x27   : > { %p649_p3 = por %p648_p6, %p647_p12 }
  0x28   : > { %p643_p0 = pneg %p642_p13 }
  0x2a   : > { %p650_p7 = pnand %p649_p3, %p643_p0 }
  0x2c   : > { %653 = shalt.err (!%p650_p7)
}
  0x2d   : > { %s794_s18 = smov 128   ;;  %s795_s20 = smov 8  }
  0x2e   : > { %537 = dma.hbm_to_vmem [thread:$0]  (!%p892_p2), %s1056_s0, 256, %s156_s28, [#allocation9], %s794_s18, %s794_s18, %s795_s20  }
  0x2f   : > { %p510_p13 = scmp.ge.s32.totalorder %s791_s16, 1  ;;  %p187_p4 = scmp.lt.s32.totalorder %s791_s16, 3 }
  0x30   : > { %s796_s30 = smov [#allocation11]   ;;  %s654_s6 = scalar_lea.hbm %s1057_s1, 256 }
  0x31   : > { %p923_p8 = pnand %p510_p13, %p187_p4  ;;  %s179_s3 = sshll.u32 %s796_s30, 4  ;;  %s180_s3 = int_to_ptr.vmem [resolvable:$true] %s179_s3 }
  0x32   : > { %p655_p6 = scmp.ne.s32.totalorder %s1057_s1, %s654_s6  ;;  %p661_p9 = scmp.lt.u32.totalorder %s654_s6, %s654_s6 }
  0x33   : > { %s1066_s27 = scalar_select %p923_p8, 1, 0 }
  0x34   : > { %p657_p12 = pnand %p655_p6, %p626_p5  ;;  %p663_p10 = scmp.lt.u32.totalorder %s654_s6, %s1057_s1 }
  0x36   : > { %p658_p0 = pneg %p657_p12  ;;  %p664_p11 = por %p663_p10, %p661_p9 }
  0x38   : > { %p665_p1 = pnand %p664_p11, %p658_p0 }
  0x3a   : > { %668 = shalt.err (!%p665_p1)
}
  0x3b   : > { %s669_s17 = scalar_lea.vmem %s180_s3, 256  ;;  %s676_s22 = scalar_lea.vmem %s180_s3, 512 }
  0x3c   : > { %p670_p3 = scmp.ne.s32.totalorder %s180_s3, %s669_s17  ;;  %p677_p4 = scmp.lt.s32.totalorder %s180_s3, %s180_s3 }
  0x3d   : > { %p678_p8 = scmp.lt.s32.totalorder %s676_s22, %s669_s17 }
  0x3e   : > { %p672_p7 = pnand %p670_p3, %p626_p5 }
  0x3f   : > { %p679_p6 = por %p678_p8, %p677_p4 }
  0x40   : > { %p673_p13 = pneg %p672_p7 }
  0x42   : > { %p680_p12 = pnand %p679_p6, %p673_p13 }
  0x44   : > { %683 = shalt.err (!%p680_p12)
}
  0x45   : > { %540 = dma.hbm_to_vmem [thread:$0]  (!%p892_p2), %s1057_s1, 256, %s180_s3, [#allocation12], %s794_s18, %s794_s18, %s795_s20  }
  0x46   : > { %p1067_p0 = scmp.ne.s32.totalorder %s1066_s27, 0 }
  0x47   : > { %s193_s4 = sand.u32 (!%p1067_p0), 1, %s779_s13   ;;  %p1068_p5 = scmp.ne.s32.totalorder (!%p1067_p0), %s1062_s21, 0 }
  0x48   : > { %191 = sbr.rel (%p1067_p0) target bundleno = 144 (0x90), region = 28  ;;  %s511_s5 = sshll.u32 (!%p1067_p0), %s193_s4, 4 }
  0x49   : > { %s194_s6 = scalar_lea.sflag (!%p1067_p0), [#allocation9], %s193_s4  ;;  %s953_s7 = scalar_lea.vmem (!%p1067_p0), [#allocation8], %s511_s5 }
  0x4f   : > { %749 = dma.done.wait (%p1068_p5), %s194_s6, 256  }
  0x50   : > { %751 = vsyncadd (%p1068_p5), %s194_s6, 4294967040  ;;  %s203_s29 = scalar_lea.sflag [#allocation12], %s193_s4  ;;  %s959_s8 = scalar_lea.vmem [#allocation11], %s511_s5 }
  0x51   : > { %753 = dma.done.wait (%p1068_p5), %s203_s29, 256  }
  0x52   : > { %755 = vsyncadd (%p1068_p5), %s203_s29, 4294967040  ;;  %s229_s18 = sand.u32 1, %s767_s10   ;;  %s513_s20 = sshll.u32 %s783_s14, 4  ;;  %v797_v0 = vmov 0.0  }
  0x53   : > { %s526_s27 = smul.u32 48, %s229_s18  ;;  %244 = vst [vmem:[#allocation2] sm:$0xff] %v797_v0  ;;  %245 = vst [vmem:[#allocation3] sm:$0xff] %v797_v0  ;;  %s971_s3 = sadd.s32 16, %s513_s20 }
  0x54   : > { %246 = vst [vmem:[#allocation4] sm:$0xff] %v797_v0  ;;  %247 = vst [vmem:[#allocation5] sm:$0xff] %v797_v0  ;;  %p514_p2 = scmp.gt.s32.totalorder %s971_s3, 16 }
  0x55   : > { %248 = vst [vmem:[#allocation6] sm:$0xff] %v797_v0  ;;  %249 = vst [vmem:[#allocation7] sm:$0xff] %v797_v0  ;;  %s973_s21 = scalar_lea.vmem [#allocation13], %s526_s27  ;;  %v257_v1 = vld [vmem:[%s953_s7] sm:$0xff] (!%p514_p2)  ;;  %v258_v2 = vld [vmem:[%s953_s7 + $0x8] sm:$0xff] (!%p514_p2) }
  0x56   : > { %256 = sbr.rel (%p514_p2) target bundleno = 97 (0x61), region = 44  ;;  %v263_v4 = vadd.f32 (!%p514_p2), %v258_v2, %v257_v1  ;;  %v259_v5 = vld [vmem:[%s959_s8] sm:$0xff] (!%p514_p2)  ;;  %v260_v6 = vld [vmem:[%s959_s8 + $0x8] sm:$0xff] (!%p514_p2)  ;;  %v267_v8 = vmul.f32 (!%p514_p2), %v257_v1, %v257_v1  ;;  %v268_v9 = vmul.f32 (!%p514_p2), %v258_v2, %v258_v2 }
  0x57   : > { %v265_v10 = vadd.f32 (!%p514_p2), %v260_v6, %v259_v5  ;;  %v271_v12 = vmul.f32 (!%p514_p2), %v259_v5, %v259_v5  ;;  %v272_v13 = vmul.f32 (!%p514_p2), %v260_v6, %v260_v6  ;;  %v275_v14 = vmul.f32 (!%p514_p2), %v259_v5, %v257_v1 }
  0x58   : > { %v269_v16 = vadd.f32 (!%p514_p2), %v268_v9, %v267_v8  ;;  %v276_v18 = vmul.f32 (!%p514_p2), %v260_v6, %v258_v2  ;;  %v261_v19 = vsub.f32 (!%p514_p2), %v257_v1, %v259_v5  ;;  %v262_v23 = vsub.f32 (!%p514_p2), %v258_v2, %v260_v6 }
  0x59   : > { %v273_v21 = vadd.f32 (!%p514_p2), %v272_v13, %v271_v12 }
  0x5a   : > { %v283_v3 = vld [vmem:[#allocation2] sm:$0xff] (!%p514_p2)  ;;  %v286_v7 = vld [vmem:[#allocation3] sm:$0xff] (!%p514_p2)  ;;  %v277_v25 = vadd.f32 (!%p514_p2), %v276_v18, %v275_v14  ;;  %v279_v26 = vmul.f32 (!%p514_p2), %v261_v19, %v261_v19  ;;  %v280_v28 = vmul.f32 (!%p514_p2), %v262_v23, %v262_v23 }
  0x5b   : > { %v289_v11 = vld [vmem:[#allocation4] sm:$0xff] (!%p514_p2)  ;;  %v284_v15 = vadd.f32 (!%p514_p2), %v283_v3, %v263_v4  ;;  %v292_v17 = vld [vmem:[#allocation5] sm:$0xff] (!%p514_p2)  ;;  %v287_v20 = vadd.f32 (!%p514_p2), %v286_v7, %v265_v10 }
  0x5c   : > { %v295_v22 = vld [vmem:[#allocation6] sm:$0xff] (!%p514_p2)  ;;  %v290_v24 = vadd.f32 (!%p514_p2), %v289_v11, %v269_v16  ;;  %v293_v27 = vadd.f32 (!%p514_p2), %v292_v17, %v273_v21  ;;  %v298_v30 = vld [vmem:[#allocation7] sm:$0xff] (!%p514_p2)  ;;  %v281_v31 = vadd.f32 (!%p514_p2), %v280_v28, %v279_v26 }
  0x5d   : > { %285 = vst [vmem:[#allocation2] sm:$0xff] %v284_v15  ;;  %288 = vst [vmem:[#allocation3] sm:$0xff] %v287_v20  ;;  %v296_v29 = vadd.f32 %v295_v22, %v277_v25 }
  0x5e   : > { %291 = vst [vmem:[#allocation4] sm:$0xff] %v290_v24  ;;  %294 = vst [vmem:[#allocation5] sm:$0xff] %v293_v27  ;;  %v299_v32 = vadd.f32 %v298_v30, %v281_v31 }
  0x5f   : > { %297 = vst [vmem:[#allocation6] sm:$0xff] %v296_v29 }
  0x60   : > { %300 = vst [vmem:[#allocation7] sm:$0xff] %v299_v32 }
  0x61 PF: > { %p515_p8 = scmp.le.s32.totalorder %s971_s3, 16 }
  0x62   : > { %v310_v33 = vlaneseq (!%p515_p8)  ;;  %v313_v34 = vstv (!%p515_p8), %s513_s20  ;;  %v305_v36 = vld [vmem:[%s953_s7] sm:$0xff] (!%p515_p8)  ;;  %v306_v40 = vld [vmem:[%s953_s7 + $0x8] sm:$0xff] (!%p515_p8) }
  0x63   : > { %304 = sbr.rel (%p515_p8) target bundleno = 118 (0x76), region = 48  ;;  %v307_v39 = vld [vmem:[%s959_s8] sm:$0xff] (!%p515_p8)  ;;  %v308_v42 = vld [vmem:[%s959_s8 + $0x8] sm:$0xff] (!%p515_p8) }
  0x64   : > { %v311_v35 = vshrl.u32 (!%p515_p8), %v310_v33, 7 }
  0x65   : > { %v350_v57 = vld [vmem:[#allocation4] sm:$0xff] (!%p515_p8)  ;;  %v353_v58 = vld [vmem:[#allocation5] sm:$0xff] (!%p515_p8) }
  0x66   : > { %v312_v37 = vadd.s32 (!%p515_p8), 8, %v311_v35  ;;  %v314_v38 = vadd.s32 (!%p515_p8), %v313_v34, %v311_v35  ;;  %v356_v2 = vld [vmem:[#allocation6] sm:$0xff] (!%p515_p8) }
  0x67   : > { %v359_v7 = vld [vmem:[#allocation7] sm:$0xff] (!%p515_p8) }
  0x68   : > { %v315_v41 = vadd.s32 (!%p515_p8), %v313_v34, %v312_v37  ;;  %vm316_vm0 = vcmp.lt.s32.totalorder (!%p515_p8), %v314_v38, 16  ;;  %v344_v48 = vld [vmem:[#allocation2] sm:$0xff] (!%p515_p8)  ;;  %v347_v50 = vld [vmem:[#allocation3] sm:$0xff] (!%p515_p8) }
  0x69   : > { %v318_v43 = vsel (!%p515_p8), %vm316_vm0, %v305_v36, 0.0  ;;  %v320_v44 = vsel (!%p515_p8), %vm316_vm0, %v307_v39, 0.0 }
  0x6a   : > { %vm317_vm1 = vcmp.lt.s32.totalorder %v315_v41, 16  ;;  %v328_v45 = vmul.f32 %v318_v43, %v318_v43  ;;  %v332_v46 = vmul.f32 %v320_v44, %v320_v44  ;;  %v336_v51 = vmul.f32 %v320_v44, %v318_v43 }
  0x6b   : > { %v319_v47 = vsel %vm317_vm1, %v306_v40, 0.0  ;;  %v321_v49 = vsel %vm317_vm1, %v308_v42, 0.0  ;;  %v322_v52 = vsub.f32 %v318_v43, %v320_v44 }
  0x6c   : > { %v324_v53 = vadd.f32 %v319_v47, %v318_v43  ;;  %v326_v54 = vadd.f32 %v321_v49, %v320_v44  ;;  %v329_v55 = vmul.f32 %v319_v47, %v319_v47  ;;  %v333_v56 = vmul.f32 %v321_v49, %v321_v49 }
  0x6d   : > { %v337_v59 = vmul.f32 %v321_v49, %v319_v47  ;;  %v323_v60 = vsub.f32 %v319_v47, %v321_v49  ;;  %v340_v61 = vmul.f32 %v322_v52, %v322_v52 }
  0x6e   : > { %v345_v62 = vadd.f32 %v344_v48, %v324_v53  ;;  %v348_v63 = vadd.f32 %v347_v50, %v326_v54  ;;  %v330_v0 = vadd.f32 %v329_v55, %v328_v45  ;;  %v334_v1 = vadd.f32 %v333_v56, %v332_v46 }
  0x6f   : > { %v338_v3 = vadd.f32 %v337_v59, %v336_v51  ;;  %v341_v4 = vmul.f32 %v323_v60, %v323_v60 }
  0x70   : > { %346 = vst [vmem:[#allocation2] sm:$0xff] %v345_v62  ;;  %349 = vst [vmem:[#allocation3] sm:$0xff] %v348_v63  ;;  %v351_v5 = vadd.f32 %v350_v57, %v330_v0  ;;  %v354_v6 = vadd.f32 %v353_v58, %v334_v1 }
  0x71   : > { %v357_v8 = vadd.f32 %v356_v2, %v338_v3  ;;  %v342_v9 = vadd.f32 %v341_v4, %v340_v61 }
  0x72   : > { %352 = vst [vmem:[#allocation4] sm:$0xff] %v351_v5  ;;  %355 = vst [vmem:[#allocation5] sm:$0xff] %v354_v6 }
  0x73   : > { %358 = vst [vmem:[#allocation6] sm:$0xff] %v357_v8  ;;  %v360_v10 = vadd.f32 %v359_v7, %v342_v9 }
  0x75   : > { %361 = vst [vmem:[#allocation7] sm:$0xff] %v360_v10 }
  0x76 PF: > { %s527_s28 = smul.u32 768, %s783_s14  ;;  %s396_s12 = sshll.u32 %s973_s21, 4  ;;  %s1000_s12 = int_to_ptr.vmem [resolvable:$true] %s396_s12 }
  0x77   : > { %v365_v11 = vld [vmem:[#allocation2] sm:$0xff]  ;;  %v367_v12 = vld [vmem:[#allocation3] sm:$0xff]  ;;  %s1004_s14 = scalar_lea.sflag [#allocation10], %s229_s18  ;;  %s684_s30 = scalar_lea.vmem %s1000_s12, 768 }
  0x78   : > { %366 = vst [vmem:[%s973_s21] sm:$0xff] %v365_v11  ;;  %516 = vst [vmem:[%s973_s21 + $0x8] sm:$0xff] %v367_v12  ;;  %s998_s23 = scalar_lea.hbm %s1058_s2, %s527_s28  ;;  %p685_p9 = scmp.ne.s32.totalorder %s1000_s12, %s684_s30 }
  0x79   : > { %v370_v13 = vld [vmem:[#allocation4] sm:$0xff]  ;;  %v373_v14 = vld [vmem:[#allocation5] sm:$0xff]  ;;  %p1069_p10 = scmp.ne.s32.totalorder %s1063_s25, 0  ;;  %s798_s4 = smov [#allocation13]  }
  0x7a   : > { %517 = vst [vmem:[%s973_s21 + $0x10] sm:$0xff] %v370_v13  ;;  %v376_v15 = vld [vmem:[#allocation6] sm:$0xff]  ;;  %518 = vst [vmem:[%s973_s21 + $0x18] sm:$0xff] %v373_v14  ;;  %s688_s5 = sshll.u32 %s798_s4, 4  ;;  %s689_s5 = int_to_ptr.vmem [resolvable:$false] %s688_s5 }
  0x7b   : > { %519 = vst [vmem:[%s973_s21 + $0x20] sm:$0xff] %v376_v15  ;;  %p686_p11 = pnand %p685_p9, %p1069_p10  ;;  %s690_s6 = scalar_lea.vmem %s689_s5, 1536 }
  0x7c   : > { %v379_v16 = vld [vmem:[#allocation7] sm:$0xff]  ;;  %p691_p3 = scmp.lt.s32.totalorder %s1000_s12, %s689_s5  ;;  %p692_p7 = scmp.lt.s32.totalorder %s690_s6, %s684_s30 }
  0x7d   : > { %520 = vst [vmem:[%s973_s21 + $0x28] sm:$0xff] %v379_v16  ;;  %p687_p1 = pneg %p686_p11 }
  0x7e   : > { %p693_p13 = por %p692_p7, %p691_p3 }
  0x80   : > { %p694_p4 = pnand %p693_p13, %p687_p1 }
  0x82   : > { %697 = shalt.err (!%p694_p4)
}
  0x83   : > { %s698_s7 = scalar_lea.hbm %s998_s23, 768  ;;  %s702_s18 = scalar_lea.hbm %s1058_s2, 1536 }
  0x84   : > { %p699_p6 = scmp.ne.s32.totalorder %s998_s23, %s698_s7  ;;  %p703_p5 = scmp.lt.u32.totalorder %s998_s23, %s1058_s2 }
  0x85   : > { %p704_p2 = scmp.lt.u32.totalorder %s702_s18, %s698_s7  ;;  %p706_p9 = scmp.lt.u32.totalorder %s698_s7, %s998_s23 }
  0x86   : > { %p700_p12 = pnand %p699_p6, %p1069_p10 }
  0x87   : > { %p705_p8 = por %p704_p2, %p703_p5 }
  0x88   : > { %p701_p0 = pneg %p700_p12 }
  0x89   : > { %p707_p11 = por %p706_p9, %p705_p8 }
  0x8b   : > { %p708_p1 = pnand %p707_p11, %p701_p0 }
  0x8d   : > { %711 = shalt.err (!%p708_p1)
}
  0x8e   : > { %s799_s3 = smov 128   ;;  %s800_s21 = smov 8  }
  0x8f   : > { %532 = dma.vmem_to_hbm [thread:$0]  (%p1069_p10), %s1000_s12, 768, %s998_s23, %s1004_s14, %s799_s3, %s799_s3, %s800_s21  }
  0x90 PF: > { %s411_s28 = sand.u32 1, %s763_s9   ;;  %p1070_p3 = scmp.ne.s32.totalorder %s1064_s26, 0 }
  0x91   : > { %p1071_p7 = scmp.ge.s32.totalorder %s791_s16, 2  ;;  %s412_s17 = scalar_lea.sflag [#allocation10], %s411_s28 }
  0x93   : > { %p542_p13 = pnand %p1071_p7, %p1070_p3 }
  0x95   : > { %757 = dma.done.wait (!%p542_p13), %s412_s17, 768  }
  0x96   : > { %759 = vsyncadd (!%p542_p13), %s412_s17, 4294966528  ;;  %s21_s16 = sadd.s32 1, %s791_s16   ;;  %s1072_s9 = smov %s767_s10 }
  0x97   : > { %p18_p4 = scmp.ge.s32.totalorder %s21_s16, 4   ;;  %s1073_s10 = smov %s771_s11 }
  0x98   : > { %s1074_s11 = smov %s874_s24  ;;  %s1075_s12 = smov %s779_s13 }
  0x99   : > { %s1046_s13 = smov 0   ;;  %s1076_s14 = smov %s787_s15 }
  0x9a   : > { %s1077_s15 = smov %s1079_s19  ;;  %20 = sbr.rel (!%p18_p4) target bundleno = 9 (0x9), region = 107 }
  0xa1   :  { %417 = vsyncpa [#allocation9], 1 }
  0xa2   :  { %419 = vsyncpa [#allocation9 + $0x1], 1 }
  0xa3   :  { %420 = vsyncpa [#allocation12], 1 }
  0xa4   :  { %422 = vsyncpa [#allocation12 + $0x1], 1 }
  0xa5   :  { %423 = vsyncpa [#allocation10], 1 }
  0xa6   :  { %425 = vsyncpa [#allocation10 + $0x1], 1 }

</bundles_post_ra>
